<compile_context>
chip_gen: v6e
topology: v6e:2x2x1
jax: 0.10.0
libtpu: 0.0.40
codegen_flags: <defaults>
</compile_context>

<pallas_src>
import functools

import jax
import jax.numpy as jnp
from jax.experimental import pallas as pl
from jax.experimental.pallas import tpu as pltpu

HID2 = 200                          # gc2 output width (fixed in the module)
VMEM_LIMIT = 48 * 1024 * 1024       # safe under v7x's 64 MiB/TC budget


def _round_up(x, m):
    return ((x + m - 1) // m) * m


def _pick_tile(padded_dim, candidates=(1024, 512, 256, 128)):
    for c in candidates:
        if padded_dim % c == 0:
            return c
    return padded_dim


def _choose_tiles(N):
    """Padded node count and (row, K) tiles for the GC stages.

    - Np is padded to >= 256 and, for larger graphs, to a multiple of 512 so
      tiles never silently degrade to 128-wide.
    - tm is the largest candidate (<= 1024) that still leaves >= 2 row tiles,
      keeping both v7x TensorCores busy via the 'parallel' row axis.
    """
    if N <= 256:
        Np = 256
    else:
        Np = _round_up(N, 512)
    tk = min(512, Np)
    tm = 128
    for cand in (1024, 512, 256, 128):
        if Np % cand == 0 and Np // cand >= 2:
            tm = cand
            break
    return Np, tm, tk


def _pad2d(a, rows, cols, dtype):
    out = jnp.zeros((rows, cols), dtype)
    return out.at[: a.shape[0], : a.shape[1]].set(a.astype(dtype))


# ---------------------------------------------------------------------------
# Stage A: plain tiled matmul (support1 = x @ W1), bf16 in / f32 accumulate.
# ---------------------------------------------------------------------------
def _matmul_kernel(x_ref, w_ref, o_ref, acc_ref):
    @pl.when(pl.program_id(1) == 0)
    def _():
        acc_ref[...] = jnp.zeros_like(acc_ref)

    acc_ref[...] += jnp.dot(x_ref[...], w_ref[...],
                            preferred_element_type=jnp.float32)

    @pl.when(pl.program_id(1) == pl.num_programs(1) - 1)
    def _():
        o_ref[...] = acc_ref[...].astype(o_ref.dtype)


def _matmul(x, w, tm, tk, out_dtype):
    M, K = x.shape
    _, N = w.shape
    out_bytes = jnp.dtype(out_dtype).itemsize
    cost = pl.CostEstimate(
        flops=2 * M * K * N,
        transcendentals=0,
        bytes_accessed=M * K * 2 + (M // tm) * K * N * 2 + M * N * out_bytes,
    )
    return pl.pallas_call(
        _matmul_kernel,
        out_shape=jax.ShapeDtypeStruct((M, N), out_dtype),
        grid=(M // tm, K // tk),
        in_specs=[
            pl.BlockSpec((tm, tk), lambda i, k: (i, k)),
            pl.BlockSpec((tk, N), lambda i, k: (k, 0)),
        ],
        out_specs=pl.BlockSpec((tm, N), lambda i, k: (i, 0)),
        scratch_shapes=[pltpu.VMEM((tm, N), jnp.float32)],
        compiler_params=pltpu.CompilerParams(
            dimension_semantics=("parallel", "arbitrary"),
            vmem_limit_bytes=VMEM_LIMIT),
        cost_estimate=cost,
    )(x, w)


# ---------------------------------------------------------------------------
# Stages B & C: out = relu(adj_c @ src + b_in) @ W_out [+ b_out]
# adj_c is the pre-combined adjacency (adj + v*adj_topic, done once in the
# wrapper), streamed as the single dominant HBM operand.
# ---------------------------------------------------------------------------
def _gc_fused_kernel(has_out_bias, *refs):
    if has_out_bias:
        adj_ref, src_ref, b_in_ref, w_out_ref, b_out_ref, out_ref, acc_ref = refs
    else:
        adj_ref, src_ref, b_in_ref, w_out_ref, out_ref, acc_ref = refs

    k = pl.program_id(1)

    @pl.when(k == 0)
    def _():
        acc_ref[...] = jnp.zeros_like(acc_ref)

    acc_ref[...] += jnp.dot(adj_ref[...], src_ref[...],
                            preferred_element_type=jnp.float32)

    @pl.when(k == pl.num_programs(1) - 1)
    def _():
        # TODO(synk): dropout is identity here (inference); training parity
        # would need pltpu.prng_seed / prng_random_bits masking of h.
        h = jnp.maximum(acc_ref[...] + b_in_ref[...], 0.0)
        out = jnp.dot(h.astype(w_out_ref.dtype), w_out_ref[...],
                      preferred_element_type=jnp.float32)
        if has_out_bias:
            out = out + b_out_ref[...]
        out_ref[...] = out.astype(out_ref.dtype)


def _gc_layer(adj_c, src, b_in, w_out, b_out, tm, tk, out_dtype):
    Np = adj_c.shape[0]
    F_in = src.shape[1]
    F_out = w_out.shape[1]
    has_out_bias = b_out is not None

    kernel = functools.partial(_gc_fused_kernel, has_out_bias)

    in_specs = [
        pl.BlockSpec((tm, tk), lambda i, k: (i, k)),       # adj_c (dominant stream)
        pl.BlockSpec((tk, F_in), lambda i, k: (k, 0)),     # support tile
        pl.BlockSpec((1, F_in), lambda i, k: (0, 0)),      # b_in (resident)
        pl.BlockSpec((F_in, F_out), lambda i, k: (0, 0)),  # W_out (resident)
    ]
    operands = [adj_c, src, b_in, w_out]
    if has_out_bias:
        in_specs.append(pl.BlockSpec((1, F_out), lambda i, k: (0, 0)))
        operands.append(b_out)

    out_bytes = jnp.dtype(out_dtype).itemsize
    cost = pl.CostEstimate(
        flops=2 * Np * Np * F_in + 2 * Np * F_in * F_out,
        transcendentals=0,
        bytes_accessed=(Np * Np * 2                    # adjacency (bf16)
                        + (Np // tm) * Np * F_in * 2   # support re-stream
                        + F_in * F_out * 2             # resident weight
                        + Np * F_out * out_bytes),     # output
    )

    return pl.pallas_call(
        kernel,
        out_shape=jax.ShapeDtypeStruct((Np, F_out), out_dtype),
        grid=(Np // tm, Np // tk),
        in_specs=in_specs,
        out_specs=pl.BlockSpec((tm, F_out), lambda i, k: (i, 0)),
        scratch_shapes=[pltpu.VMEM((tm, F_in), jnp.float32)],
        compiler_params=pltpu.CompilerParams(
            dimension_semantics=("parallel", "arbitrary"),
            vmem_limit_bytes=VMEM_LIMIT),
        cost_estimate=cost,
    )(*operands)


# ---------------------------------------------------------------------------
# Public wrapper
# ---------------------------------------------------------------------------
def cross_gcn_forward(x, adj, mask, params, adj_topic=None, v=1.0):
    """Fused Pallas forward for cross_GCN.

    `mask` is accepted for API parity but unused: softmax over a size-1 axis
    is exactly 1.0, so softmax((mask@h2).sum(-1)) * h2 == h2.
    """
    del mask  # mathematically dead path (see docstring)

    N, nfeat = x.shape
    nhid = params["w1"].shape[1]
    nclass = params["wfc_t"].shape[1]

    # Lane/sublane-friendly padded sizes (all padding is zero-filled -> exact).
    Np, tm, tk_n = _choose_tiles(N)
    nfeat_p = _round_up(nfeat, 128)
    nhid_p = _round_up(nhid, 128)
    hid2_p = _round_up(HID2, 128)        # 200 -> 256
    nclass_p = _round_up(nclass, 128)    # lane-dense output
    tk_f = _pick_tile(nfeat_p)

    bf16, f32 = jnp.bfloat16, jnp.float32

    # Pre-combine adj_c = adj + v*adj_topic once (f32 math, single bf16 round),
    # folded into the padding/cast fusion.  Halves adjacency HBM traffic in the
    # GC layers vs. streaming adj and adj_topic separately.
    if adj_topic is not None:
        adj_c = adj.astype(f32) + adj_topic.astype(f32) * jnp.float32(v)
    else:
        adj_c = adj
    adj_p = _pad2d(adj_c, Np, Np, bf16)

    x_p = _pad2d(x, Np, nfeat_p, bf16)
    w1_p = _pad2d(params["w1"], nfeat_p, nhid_p, bf16)
    b1_p = _pad2d(params["b1"].reshape(1, -1), 1, nhid_p, f32)
    w2_p = _pad2d(params["w2"], nhid_p, hid2_p, bf16)
    b2_p = _pad2d(params["b2"].reshape(1, -1), 1, hid2_p, f32)
    wfc_p = _pad2d(params["wfc_t"], hid2_p, nclass_p, bf16)
    bfc_p = _pad2d(params["bfc"].reshape(1, -1), 1, nclass_p, f32)

    # Stage A: support1 = x @ W1
    support1 = _matmul(x_p, w1_p, tm, tk_f, bf16)

    # Stage B: support2 = relu(adj_c @ support1 + b1) @ W2   (dropout = id, no out-bias)
    support2 = _gc_layer(adj_p, support1, b1_p, w2_p, None, tm, tk_n, bf16)

    # Stage C: out = relu(adj_c @ support2 + b2) @ Wfc^T + bfc
    out_p = _gc_layer(adj_p, support2, b2_p, wfc_p, bfc_p, tm, tk_n, f32)

    return out_p[:N, :nclass]


# ---------------------------------------------------------------------------
# Parameter init (mimics PyTorch reset_parameters) and references
# ---------------------------------------------------------------------------
def init_params(key, nfeat, nhid, nclass):
    k = jax.random.split(key, 6)
    stdv1 = 1.0 / jnp.sqrt(nhid)
    stdv2 = 1.0 / jnp.sqrt(float(HID2))
    stdv_fc = 1.0 / jnp.sqrt(float(HID2))
    return {
        "w1": jax.random.uniform(k[0], (nfeat, nhid), jnp.float32, -stdv1, stdv1),
        "b1": jax.random.uniform(k[1], (nhid,), jnp.float32, -stdv1, stdv1),
        "w2": jax.random.uniform(k[2], (nhid, HID2), jnp.float32, -stdv2, stdv2),
        "b2": jax.random.uniform(k[3], (HID2,), jnp.float32, -stdv2, stdv2),
        # nn.Linear(200, nclass).weight is (nclass, 200); stored transposed.
        "wfc_t": jax.random.uniform(k[4], (HID2, nclass), jnp.float32, -stdv_fc, stdv_fc),
        "bfc": jax.random.uniform(k[5], (nclass,), jnp.float32, -stdv_fc, stdv_fc),
    }


def reference_forward(x, adj, mask, params, adj_topic=None, v=1.0):
    """Plain-JAX f32 reference with the full original math (incl. mask path)."""
    if adj_topic is not None:
        adj = adj + adj_topic * v
    h1 = jnp.maximum(adj @ (x @ params["w1"]) + params["b1"], 0.0)
    h2 = jnp.maximum(adj @ (h1 @ params["w2"]) + params["b2"], 0.0)
    mat = (mask @ h2).sum(-1, keepdims=True)
    mat = jax.nn.softmax(mat, axis=-1)          # size-1 axis -> all ones
    h2 = mat * h2
    return h2 @ params["wfc_t"] + params["bfc"]


def reference_forward_bf16(x, adj, mask, params, adj_topic=None, v=1.0):
    """Reference mimicking the kernel's bf16-operand / f32-accumulate math."""
    bf16, f32 = jnp.bfloat16, jnp.float32
    if adj_topic is not None:
        adj_c = (adj.astype(f32) + adj_topic.astype(f32) * jnp.float32(v)).astype(bf16)
    else:
        adj_c = adj.astype(bf16)
    s1 = jnp.dot(x.astype(bf16), params["w1"].astype(bf16),
                 preferred_element_type=f32).astype(bf16)
    h1 = jnp.maximum(jnp.dot(adj_c, s1, preferred_element_type=f32)
                     + params["b1"], 0.0)
    s2 = jnp.dot(h1.astype(bf16), params["w2"].astype(bf16),
                 preferred_element_type=f32).astype(bf16)
    h2 = jnp.maximum(jnp.dot(adj_c, s2, preferred_element_type=f32)
                     + params["b2"], 0.0)
    mat = jnp.dot(mask, h2).sum(-1, keepdims=True)
    h2 = jax.nn.softmax(mat, axis=-1) * h2      # identically h2
    return (jnp.dot(h2.astype(bf16), params["wfc_t"].astype(bf16),
                    preferred_element_type=f32) + params["bfc"])


if __name__ == "__main__":
    key = jax.random.PRNGKey(0)
    kx, kadj, ktop, kmask, kparam = jax.random.split(key, 5)

    N, nfeat, nhid, nclass = 16, 32, 32, 8

    x = jax.random.normal(kx, (N, nfeat), jnp.float32)
    adj = jax.random.uniform(kadj, (N, N), jnp.float32)
    adj_topic = jax.random.uniform(ktop, (N, N), jnp.float32)
    mask = (jax.random.uniform(kmask, (N, N), jnp.float32) > 0.5).astype(jnp.float32)

    params = init_params(kparam, nfeat, nhid, nclass)

    v = 0.7
    out = jax.block_until_ready(
        cross_gcn_forward(x, adj, mask, params, adj_topic=adj_topic, v=v))
    assert out.shape == (N, nclass)

    ref_b = reference_forward_bf16(x, adj, mask, params, adj_topic=adj_topic, v=v)
    ref_f = reference_forward(x, adj, mask, params, adj_topic=adj_topic, v=v)
    assert jnp.allclose(out, ref_b, atol=5e-3, rtol=5e-3), "mismatch vs bf16 reference"
    assert jnp.allclose(out, ref_f, atol=1.5e-1, rtol=1e-1), "mismatch vs f32 reference"

    # Variant without topic adjacency (adjacency used as-is, no combine).
    out2 = jax.block_until_ready(cross_gcn_forward(x, adj, mask, params))
    ref2_b = reference_forward_bf16(x, adj, mask, params)
    assert out2.shape == (N, nclass)
    assert jnp.allclose(out2, ref2_b, atol=5e-3, rtol=5e-3), "mismatch (no adj_topic)"

    print("KERNEL_OK")
</pallas_src>

<mosaic_0001>
module attributes {stable_mosaic.version = 11 : i64} {
  func.func @_matmul_kernel(%arg0: i32, %arg1: i32, %arg2: memref<128x128xbf16, #tpu.memory_space<vmem>>, %arg3: memref<128x128xbf16, #tpu.memory_space<vmem>>, %arg4: memref<128x128xbf16, #tpu.memory_space<vmem>>, %arg5: memref<128x128xf32, #tpu.memory_space<vmem>>) attributes {dimension_semantics = [#tpu.dimension_semantics<parallel>, #tpu.dimension_semantics<arbitrary>], iteration_bounds = array<i64: 2, 1>, scalar_prefetch = 0 : i64, scratch_operands = 1 : i64, tpu.core_type = #tpu.core_type<tc>, window_params = [{transform_indices = @transform_0, window_bounds = array<i64: 128, 128>}, {transform_indices = @transform_1, window_bounds = array<i64: 128, 128>}, {transform_indices = @transform_2, window_bounds = array<i64: 128, 128>}]} {
    %c0_i32 = arith.constant 0 : i32
    %0 = arith.cmpi eq, %arg1, %c0_i32 : i32
    %1 = arith.extui %0 : i1 to i32
    %c0_i32_0 = arith.constant 0 : i32
    %2 = arith.cmpi ne, %1, %c0_i32_0 : i32
    scf.if %2 {
      %cst_10 = arith.constant 0.000000e+00 : f32
      %12 = vector.broadcast %cst_10 : f32 to vector<128x128xf32>
      %c0_11 = arith.constant 0 : index
      %c0_12 = arith.constant 0 : index
      %13 = vector.load %arg5[%c0_11, %c0_12] : memref<128x128xf32, #tpu.memory_space<vmem>>, vector<128x128xf32>
      tpu.vector_store %arg5[%c0_11, %c0_12], %12 {strides = array<i32>} : memref<128x128xf32, #tpu.memory_space<vmem>>, vector<128x128xf32>,
    } else {
    }
    %c0 = arith.constant 0 : index
    %c0_1 = arith.constant 0 : index
    %3 = vector.load %arg5[%c0, %c0_1] : memref<128x128xf32, #tpu.memory_space<vmem>>, vector<128x128xf32>
    %c0_2 = arith.constant 0 : index
    %c0_3 = arith.constant 0 : index
    %4 = vector.load %arg2[%c0_2, %c0_3] : memref<128x128xbf16, #tpu.memory_space<vmem>>, vector<128x128xbf16>
    %c0_4 = arith.constant 0 : index
    %c0_5 = arith.constant 0 : index
    %5 = vector.load %arg3[%c0_4, %c0_5] : memref<128x128xbf16, #tpu.memory_space<vmem>>, vector<128x128xbf16>
    %cst = arith.constant dense<0.000000e+00> : vector<128x128xf32>
    %6 = tpu.matmul %4, %5, %cst {dimension_numbers = #tpu.dot_dimension_numbers<[1], [0], [0], [1], [0, 0, 1, 1], [], []>} : vector<128x128xbf16>, vector<128x128xbf16>, vector<128x128xf32> -> vector<128x128xf32>
    %7 = arith.addf %3, %6 : vector<128x128xf32>
    %c0_6 = arith.constant 0 : index
    %c0_7 = arith.constant 0 : index
    %8 = vector.load %arg5[%c0_6, %c0_7] : memref<128x128xf32, #tpu.memory_space<vmem>>, vector<128x128xf32>
    tpu.vector_store %arg5[%c0_6, %c0_7], %7 {strides = array<i32>} : memref<128x128xf32, #tpu.memory_space<vmem>>, vector<128x128xf32>,
    %c0_i32_8 = arith.constant 0 : i32
    %9 = arith.cmpi eq, %arg1, %c0_i32_8 : i32
    %10 = arith.extui %9 : i1 to i32
    %c0_i32_9 = arith.constant 0 : i32
    %11 = arith.cmpi ne, %10, %c0_i32_9 : i32
    scf.if %11 {
      %c0_10 = arith.constant 0 : index
      %c0_11 = arith.constant 0 : index
      %12 = vector.load %arg5[%c0_10, %c0_11] : memref<128x128xf32, #tpu.memory_space<vmem>>, vector<128x128xf32>
      %13 = arith.truncf %12 : vector<128x128xf32> to vector<128x128xbf16>
      %c0_12 = arith.constant 0 : index
      %c0_13 = arith.constant 0 : index
      %14 = vector.load %arg4[%c0_12, %c0_13] : memref<128x128xbf16, #tpu.memory_space<vmem>>, vector<128x128xbf16>
      tpu.vector_store %arg4[%c0_12, %c0_13], %13 {strides = array<i32>} : memref<128x128xbf16, #tpu.memory_space<vmem>>, vector<128x128xbf16>,
    } else {
    }
    return
  }
  func.func @transform_0(%arg0: i32, %arg1: i32) -> (i32, i32) {
    %c0_i32 = arith.constant 0 : i32
    return %arg0, %arg1 : i32, i32
  }
  func.func @transform_1(%arg0: i32, %arg1: i32) -> (i32, i32) {
    %c0_i32 = arith.constant 0 : i32
    %c0_i32_0 = arith.constant 0 : i32
    return %arg1, %c0_i32 : i32, i32
  }
  func.func @transform_2(%arg0: i32, %arg1: i32) -> (i32, i32) {
    %c0_i32 = arith.constant 0 : i32
    %c0_i32_0 = arith.constant 0 : i32
    return %arg0, %c0_i32 : i32, i32
  }
}

</mosaic_0001>

<bundles_post_ra>
// kernel: tpu_custom_call.1
= control target key start
LH: loop header
LB: loop body
LE: loop exit
PB: predicated region body
PF: predicated region fallthrough
CT: control target
= control target key end

     0   :  { %7 = vsyncpa [#allocation4], 0  ;;  %s1339_s0 = inlined_call_operand.hbm [shape: bf16[256,128], index: 0, kind: input, shape index: {}]   ;;  %s1340_s1 = inlined_call_operand.hbm [shape: bf16[128,128], index: 1, kind: input, shape index: {}]   ;;  %s1341_s2 = inlined_call_operand.hbm [shape: bf16[256,128], index: 2, kind: output, shape index: {}]  }
   0x1   :  { %9 = vsyncpa [#allocation4 + $0x1], 0 }
   0x2   :  { %10 = vsyncpa [#allocation7], 0 }
   0x3   :  { %11 = vsyncpa [#allocation5], 0 }
   0x4   :  { %13 = vsyncpa [#allocation5 + $0x1], 0  ;;  %s1138_s9 = smov 0   ;;  %s1140_s10 = smov 0  }
   0x5   :  { %s1142_s11 = smov 0   ;;  %s1144_s12 = smov 0  }
   0x6   :  { %s1146_s13 = smov 0   ;;  %s1148_s14 = smov 0  }
   0x7 LB: > { %s705_s15 = sadd.s32 4294967295, %s1114_s14   ;;  %s706_s16 = sadd.s32 4294967294, %s1114_s14   ;;  %s1114_s14 = sphi %s1148_s14, %s19_s14   ;;  %s1110_s13 = sphi %s1146_s13, %s1361_s13   ;;  %s1106_s12 = sphi %s1144_s12, %s1360_s12   ;;  %s1102_s11 = sphi %s1142_s11, %s1359_s11   ;;  %s1098_s10 = sphi %s1140_s10, %s1358_s10   ;;  %s1094_s9 = sphi %s1138_s9, %s1357_s9  }
   0x8   : > { %p53_p0 = scmp.ne.s32.totalorder %s1098_s10, %s1094_s9  ;;  %p1172_p1 = scmp.eq.s32.totalorder %s705_s15, 0 }
   0x9   : > { %p1176_p2 = scmp.eq.s32.totalorder %s705_s15, 1  ;;  %p109_p3 = scmp.eq.s32.totalorder %s706_s16, 1 }
   0xa   : > { %p1182_p4 = por %p1172_p1, %p53_p0  ;;  %p707_p5 = scmp.ge.s32.totalorder %s1114_s14, 1 }
   0xb   : > { %p1187_p6 = por %p109_p3, %p53_p0  ;;  %p116_p7 = scmp.lt.s32.totalorder %s1114_s14, 3 }
   0xc   : > { %s1346_s19 = scalar_select %p1182_p4, 1, 0 }
   0xd   : > { %s1347_s20 = scalar_select %p1187_p6, 1, 0 }
   0xe   : > { %p1192_p8 = pnand %p707_p5, %p116_p7  ;;  %s1116_s22 = smov [#allocation6]  }
   0xf   : > { %s131_s23 = sshll.u32 %s1116_s22, 4  ;;  %s31_s25 = sadd.s32 1, %s1110_s13  ;;  %s132_s23 = int_to_ptr.vmem [resolvable:$true] %s131_s23 }
  0x10   : > { %p891_p9 = pneg %p1192_p8  ;;  %s987_s26 = scalar_lea.vmem %s132_s23, 1024 }
  0x11   : > { %p988_p13 = scmp.ne.s32.totalorder %s132_s23, %s987_s26  ;;  %p995_p5 = scmp.lt.s32.totalorder %s132_s23, %s132_s23 }
  0x12   : > { %p1201_p11 = pnand %p891_p9, %p1172_p1  ;;  %p996_p7 = scmp.lt.s32.totalorder %s987_s26, %s987_s26 }
  0x14   : > { %p978_p12 = pneg %p1201_p11  ;;  %p997_p6 = por %p996_p7, %p995_p5 }
  0x16   : > { %p990_p0 = pnand %p988_p13, %p978_p12 }
  0x18   : > { %p991_p3 = pneg %p990_p0 }
  0x1a   : > { %p998_p4 = pnand %p997_p6, %p991_p3 }
  0x1c   : > { %1001 = shalt.err (!%p998_p4)
}
  0x1d   : > { %s1343_s27 = smov 64   ;;  %s1118_s28 = smov 4  }
  0x1e   : > { %894 = dma.hbm_to_vmem [thread:$0]  (!%p1201_p11), %s1340_s1, 1024, %s132_s23, [#allocation7], %s1343_s27, %s1343_s27, %s1118_s28  }
  0x1f   : > { %p33_p4 = scmp.ge.s32.totalorder %s31_s25, 2  ;;  %s40_s3 = sadd.s32 1, %s1102_s11 }
  0x20   : > { %p47_p6 = scmp.ne.s32.totalorder %s1102_s11, %s1098_s10  ;;  %p48_p9 = scmp.eq.s32.totalorder %s1114_s14, 0 }
  0x21   : > { %s1363_s25 = smov (%p33_p4, %s31_s25), 0  ;;  %p904_p0 = scmp.lt.s32.totalorder %s1114_s14, 2 }
  0x22   : > { %p1222_p12 = por %p48_p9, %p47_p6  ;;  %p1228_p13 = por %p1176_p2, %p47_p6 }
  0x23   : > { %s35_s6 = ssub.s32 %s1110_s13, %s1363_s25  ;;  %s145_s7 = sand.u32 1, %s1102_s11  }
  0x24   : > { %p38_p11 = scmp.eq.s32.totalorder %s35_s6, 0  ;;  %s710_s8 = sshll.u32 %s145_s7, 6 }
  0x25   : > { %s754_s16 = sshll.u32 %s1110_s13, 10  ;;  %s149_s26 = scalar_lea.vmem [#allocation3], %s710_s8 }
  0x26   : > { %s1237_s15 = scalar_select %p38_p11, %s1102_s11, %s40_s3  }
  0x27   : > { %s156_s24 = scalar_lea.hbm %s1339_s0, %s754_s16  ;;  %s157_s29 = sshll.u32 %s149_s26, 4  ;;  %s158_s29 = int_to_ptr.vmem [resolvable:$true] %s157_s29 }
  0x28   : > { %p1245_p2 = pnand %p904_p0, %p1222_p12  ;;  %s146_s30 = scalar_lea.sflag [#allocation4], %s145_s7 }
  0x29   : > { %s1015_s6 = scalar_lea.vmem %s158_s29, 1024  ;;  %s1119_s3 = smov [#allocation3]  }
  0x2a   : > { %p1004_p3 = pneg %p1245_p2  ;;  %p1016_p5 = scmp.ne.s32.totalorder %s158_s29, %s1015_s6 }
  0x2b   : > { %s1020_s27 = sshll.u32 %s1119_s3, 4  ;;  %s1021_s27 = int_to_ptr.vmem [resolvable:$false] %s1020_s27 }
  0x2c   : > { %p1018_p7 = pnand %p1016_p5, %p1004_p3  ;;  %s1022_s16 = scalar_lea.vmem %s1021_s27, 2048 }
  0x2d   : > { %p1023_p6 = scmp.lt.s32.totalorder %s158_s29, %s1021_s27  ;;  %p1024_p9 = scmp.lt.s32.totalorder %s1022_s16, %s1015_s6 }
  0x2e   : > { %p1019_p4 = pneg %p1018_p7 }
  0x2f   : > { %p1025_p11 = por %p1024_p9, %p1023_p6 }
  0x31   : > { %p1026_p10 = pnand %p1025_p11, %p1019_p4 }
  0x33   : > { %1029 = shalt.err (!%p1026_p10)
}
  0x34   : > { %s1353_s4 = smov 64   ;;  %169 = sbr.rel (%p1192_p8) target bundleno = 316 (0x13c), region = 28 }
  0x35   : > { %898 = dma.hbm_to_vmem [thread:$0]  (!%p1245_p2), %s156_s24, 1024, %s158_s29, %s146_s30, %s1353_s4, %s1353_s4, %s1118_s28  }
  0x36   : > { %s1259_s7 = sand.u32 (!%p1192_p8), 1, %s1098_s10   ;;  %p1354_p10 = scmp.ne.s32.totalorder (!%p1192_p8), %s1346_s19, 0 }
  0x37   : > { %s714_s27 = sshll.u32 (!%p1192_p8), %s1259_s7, 6  ;;  %s172_s8 = scalar_lea.sflag (!%p1192_p8), [#allocation4], %s1259_s7 }
  0x38   : > { %s1265_s22 = scalar_lea.vmem (!%p1192_p8), [#allocation3], %s714_s27 }
  0x39   : > { %1081 = dma.done.wait (%p1354_p10), %s172_s8, 1024  }
  0x3a   : > { %1083 = vsyncadd (%p1354_p10), %s172_s8, 4294966272 }
  0x3b   : > { %1085 = dma.done.wait (%p1172_p1), [#allocation7], 1024  }
  0x3c   : > { %1087 = vsyncadd (%p1172_p1), [#allocation7], 4294966272  ;;  %v960_v0 = vld [vmem:[#allocation6 + $0x38] sm:$0xff]   ;;  %v961_v1 = vld [vmem:[#allocation6 + $0x30] sm:$0xff]   ;;  %s199_s17 = scalar_lea.vmem [#allocation8], %s714_s27  ;;  %s771_s21 = sshll.u32 %s1106_s12, 10 }
  0x3d   : > { %835 = vmatprep.subr.bf16.mxu0 %v960_v0  ;;  %867 = vmatprep.subr.bf16.mxu1 %v960_v0  ;;  %v962_v2 = vld [vmem:[#allocation6 + $0x28] sm:$0xff]   ;;  %v963_v3 = vld [vmem:[#allocation6 + $0x20] sm:$0xff]   ;;  %v964_v6 = vld [vmem:[#allocation6 + $0x18] sm:$0xff]   ;;  %s610_s19 = sshll.u32 %s199_s17, 4  ;;  %s1291_s24 = scalar_lea.hbm %s1341_s2, %s771_s21  ;;  %s1286_s19 = int_to_ptr.vmem [resolvable:$true] %s610_s19 }
  0x3e   : > { %836 = vmatpush3.bf16.msra.mxu0 %v960_v0  ;;  %875 = vmatpush3.bf16.msra.mxu1 %v960_v0  ;;  %v968_v4 = vld [vmem:[%s1265_s22] sm:$0xff]   ;;  %v965_v7 = vld [vmem:[#allocation6 + $0x10] sm:$0xff]   ;;  %v966_v8 = vld [vmem:[#allocation6 + $0x8] sm:$0xff]   ;;  %s597_s12 = scalar_lea.sflag [#allocation5], %s1259_s7  ;;  %s1030_s26 = scalar_lea.vmem %s1286_s19, 1024 }
  0x3f   : > { %837 = vmatprep.subr.bf16.mxu0 %v961_v1  ;;  %868 = vmatprep.subr.bf16.mxu1 %v961_v1  ;;  %v969_v5 = vld [vmem:[%s1265_s22 + $0x20] sm:$0xff]   ;;  %v970_v10 = vld [vmem:[%s1265_s22 + $0x8] sm:$0xff]   ;;  %v972_v12 = vld [vmem:[%s1265_s22 + $0x10] sm:$0xff]   ;;  %p1031_p1 = scmp.ne.s32.totalorder %s1286_s19, %s1030_s26  ;;  %s1120_s29 = smov [#allocation8]  }
  0x40   : > { %851 = vmatprep.mubr.bf16.mxu0 %v968_v4  ;;  %859 = vmatprep.mubr.bf16.mxu1 %v969_v5  ;;  %v967_v9 = vld [vmem:[#allocation6] sm:$0xff]   ;;  %v971_v11 = vld [vmem:[%s1265_s22 + $0x28] sm:$0xff]   ;;  %v973_v13 = vld [vmem:[%s1265_s22 + $0x30] sm:$0xff]   ;;  %s1034_s18 = sshll.u32 %s1120_s29, 4  ;;  %s1035_s18 = int_to_ptr.vmem [resolvable:$false] %s1034_s18 }
  0x41   : > { %v974_v14 = vld [vmem:[%s1265_s22 + $0x18] sm:$0xff]   ;;  %p1032_p8 = pnand %p1031_p1, %p1228_p13  ;;  %s1036_s30 = scalar_lea.vmem %s1035_s18, 2048 }
  0x42   : > { %838 = vmatpush3.bf16.msra.mxu0 %v961_v1  ;;  %876 = vmatpush3.bf16.msra.mxu1 %v961_v1  ;;  %v975_v15 = vld [vmem:[%s1265_s22 + $0x38] sm:$0xff]   ;;  %p1037_p0 = scmp.lt.s32.totalorder %s1286_s19, %s1035_s18  ;;  %p1038_p2 = scmp.lt.s32.totalorder %s1036_s30, %s1030_s26 }
  0x43   : > { %839 = vmatprep.subr.bf16.mxu0 %v962_v2  ;;  %869 = vmatprep.subr.bf16.mxu1 %v962_v2  ;;  %p1033_p12 = pneg %p1032_p8 }
  0x44   : > { %p1039_p3 = por %p1038_p2, %p1037_p0 }
  0x46   : > { %840 = vmatpush3.bf16.msra.mxu0 %v962_v2  ;;  %877 = vmatpush3.bf16.msra.mxu1 %v962_v2  ;;  %p1040_p5 = pnand %p1039_p3, %p1033_p12 }
  0x47   : > { %841 = vmatprep.subr.bf16.mxu0 %v963_v3  ;;  %870 = vmatprep.subr.bf16.mxu1 %v963_v3 }
  0x4a   : > { %842 = vmatpush3.bf16.msra.mxu0 %v963_v3  ;;  %878 = vmatpush3.bf16.msra.mxu1 %v963_v3 }
  0x4b   : > { %843 = vmatprep.subr.bf16.mxu0 %v964_v6  ;;  %871 = vmatprep.subr.bf16.mxu1 %v964_v6 }
  0x4e   : > { %844 = vmatpush3.bf16.msra.mxu0 %v964_v6  ;;  %879 = vmatpush3.bf16.msra.mxu1 %v964_v6 }
  0x4f   : > { %845 = vmatprep.subr.bf16.mxu0 %v965_v7  ;;  %872 = vmatprep.subr.bf16.mxu1 %v965_v7 }
  0x52   : > { %846 = vmatpush3.bf16.msra.mxu0 %v965_v7  ;;  %880 = vmatpush3.bf16.msra.mxu1 %v965_v7 }
  0x53   : > { %847 = vmatprep.subr.bf16.mxu0 %v966_v8  ;;  %873 = vmatprep.subr.bf16.mxu1 %v966_v8 }
  0x56   : > { %848 = vmatpush3.bf16.msra.mxu0 %v966_v8  ;;  %881 = vmatpush3.bf16.msra.mxu1 %v966_v8 }
  0x57   : > { %849 = vmatprep.subr.bf16.mxu0 %v967_v9  ;;  %874 = vmatprep.subr.bf16.mxu1 %v967_v9 }
  0x5a   : > { %850 = vmatpush3.bf16.msra.mxu0 %v967_v9  ;;  %882 = vmatpush3.bf16.msra.mxu1 %v967_v9 }
  0x5d   : > { %852 = vmatmul.mubr.bf16.vlgmr.msra.gmra.mxu0 %v970_v10  ;;  %860 = vmatmul.mubr.bf16.vlgmr.msra.gmra.mxu1 %v971_v11 }
  0x5e   : > { %855 = vmatprep.mubr.bf16.mxu0 %v972_v12  ;;  %863 = vmatprep.mubr.bf16.mxu1 %v973_v13 }
  0x65   : > { %856 = vmatmul.mubr.bf16.gmra.mxu0 %v974_v14  ;;  %864 = vmatmul.mubr.bf16.gmra.mxu1 %v975_v15 }
 0x11d   : > { %v853_v16 = vpop.f32.mrf.mxu0  ;;  %v861_v17 = vpop.f32.mrf.mxu1 }
 0x11f   : > { %v402_v18 = vpop.f32.mrf.mxu0  ;;  %v434_v19 = vpop.f32.mrf.mxu1 }
 0x121   : > { %v854_v20 = vpop.f32.mrf.mxu0  ;;  %v862_v21 = vpop.f32.mrf.mxu1 }
 0x122   : > { %v780_v22 = vpack.c.bf16 %v854_v20, %v853_v16  ;;  %v800_v23 = vpack.c.bf16 %v862_v21, %v861_v17 }
 0x123   : > { %v405_v24 = vpop.f32.mrf.mxu0  ;;  %v437_v25 = vpop.f32.mrf.mxu1 }
 0x124   : > { %812 = vst [vmem:[%s199_s17 + $0x8] sm:$0xff] %v780_v22   ;;  %816 = vst [vmem:[%s199_s17 + $0x28] sm:$0xff] %v800_v23   ;;  %v775_v26 = vpack.c.bf16 %v405_v24, %v402_v18  ;;  %v795_v27 = vpack.c.bf16 %v437_v25, %v434_v19 }
 0x125   : > { %v857_v28 = vpop.f32.mrf.mxu0  ;;  %v865_v29 = vpop.f32.mrf.mxu1 }
 0x126   : > { %776 = vst [vmem:[%s199_s17] sm:$0xff] %v775_v26   ;;  %815 = vst [vmem:[%s199_s17 + $0x20] sm:$0xff] %v795_v27  }
 0x127   : > { %v418_v30 = vpop.f32.mrf.mxu0  ;;  %v450_v31 = vpop.f32.mrf.mxu1 }
 0x129   : > { %v858_v32 = vpop.f32.mrf.mxu0  ;;  %v866_v33 = vpop.f32.mrf.mxu1 }
 0x12a   : > { %v790_v34 = vpack.c.bf16 %v858_v32, %v857_v28  ;;  %v810_v35 = vpack.c.bf16 %v866_v33, %v865_v29 }
 0x12b   : > { %v421_v36 = vpop.f32.mrf.mxu0  ;;  %v453_v37 = vpop.f32.mrf.mxu1 }
 0x12c   : > { %814 = vst [vmem:[%s199_s17 + $0x18] sm:$0xff] %v790_v34   ;;  %818 = vst [vmem:[%s199_s17 + $0x38] sm:$0xff] %v810_v35   ;;  %v785_v38 = vpack.c.bf16 %v421_v36, %v418_v30  ;;  %v805_v39 = vpack.c.bf16 %v453_v37, %v450_v31 }
 0x12e   : > { %813 = vst [vmem:[%s199_s17 + $0x10] sm:$0xff] %v785_v38   ;;  %817 = vst [vmem:[%s199_s17 + $0x30] sm:$0xff] %v805_v39  }
 0x12f   : > { %1043 = shalt.err (!%p1040_p5)
}
 0x130   : > { %s1044_s6 = scalar_lea.hbm %s1291_s24, 1024  ;;  %s1048_s4 = scalar_lea.hbm %s1341_s2, 2048 }
 0x131   : > { %p1045_p7 = scmp.ne.s32.totalorder %s1291_s24, %s1044_s6  ;;  %p1049_p9 = scmp.lt.s32.totalorder %s1291_s24, %s1341_s2 }
 0x132   : > { %p1050_p11 = scmp.lt.s32.totalorder %s1048_s4, %s1044_s6 }
 0x133   : > { %p1046_p4 = pnand %p1045_p7, %p1228_p13 }
 0x134   : > { %p1051_p10 = por %p1050_p11, %p1049_p9 }
 0x135   : > { %p1047_p6 = pneg %p1046_p4 }
 0x137   : > { %p1052_p1 = pnand %p1051_p10, %p1047_p6 }
 0x139   : > { %1055 = shalt.err (!%p1052_p1)
}
 0x13a   : > { %s1121_s22 = smov 64   ;;  %s1122_s17 = smov 4  }
 0x13b   : > { %889 = dma.vmem_to_hbm [thread:$0]  (%p1228_p13), %s1286_s19, 1024, %s1291_s24, %s597_s12, %s1121_s22, %s1121_s22, %s1122_s17  }
 0x13c PF: > { %s625_s21 = sand.u32 1, %s1094_s9   ;;  %p1355_p8 = scmp.ne.s32.totalorder %s1347_s20, 0 }
 0x13d   : > { %p1356_p12 = scmp.ge.s32.totalorder %s1114_s14, 2  ;;  %s626_s28 = scalar_lea.sflag [#allocation5], %s625_s21 }
 0x13f   : > { %p900_p0 = pnand %p1356_p12, %p1355_p8 }
 0x141   : > { %p901_p2 = pneg %p900_p0 }
 0x143   : > { %1089 = dma.done.wait (%p901_p2), %s626_s28, 1024  }
 0x144   : > { %1091 = vsyncadd (%p901_p2), %s626_s28, 4294966272  ;;  %s19_s14 = sadd.s32 1, %s1114_s14   ;;  %s1357_s9 = smov %s1098_s10 }
 0x145   : > { %p16_p3 = scmp.ge.s32.totalorder %s19_s14, 4   ;;  %s1358_s10 = smov %s1102_s11 }
 0x146   : > { %s1359_s11 = smov %s1237_s15  ;;  %s1360_s12 = smov %s1110_s13 }
 0x147   : > { %s1361_s13 = smov %s1363_s25  ;;  %18 = sbr.rel (!%p16_p3) target bundleno = 7 (0x7), region = 86 }
 0x14c   :  { %631 = vsyncpa [#allocation4], 1 }
 0x14d   :  { %633 = vsyncpa [#allocation4 + $0x1], 1 }
 0x14e   :  { %634 = vsyncpa [#allocation7], 1 }
 0x14f   :  { %635 = vsyncpa [#allocation5], 1 }
 0x150   :  { %637 = vsyncpa [#allocation5 + $0x1], 1 }

</bundles_post_ra>
